<compile_context>
chip_gen: v5e
topology: v5e:2x2
jax: 0.10.0
libtpu: 0.0.40
codegen_flags: <defaults>
</compile_context>

<pallas_src>
import numpy as np

import jax
import jax.numpy as jnp
from jax import lax
from jax.experimental import pallas as pl
from jax.experimental.pallas import tpu as pltpu


def _round_up(x, m):
    return ((x + m - 1) // m) * m


def _cdiv(a, b):
    return -(-a // b)


def _vmem_budget_bytes():
    """Generation-aware scoped-VMEM budget: ~75% of physical VMEM.

    v5e/v6e (128 MiB physical) -> 96 MiB;  v7x (64 MiB per TensorCore) -> 48 MiB.
    Falls back to a conservative v7x-sized assumption if the query fails.
    """
    cap = None
    try:
        cap = getattr(pltpu.get_tpu_info(), "vmem_capacity_bytes", None)
    except Exception:
        cap = None
    if not cap:
        cap = 64 * 1024 * 1024
    return min((int(cap) * 3) // 4, 100 * 1024 * 1024)


def _fit_tiles(tm, tn, tk, in_bytes, budget, m_gran):
    """Shrink requested tiles until the double-buffered footprint fits the budget."""

    def footprint(a, b, c):
        # 2x double-buffered input tiles (x and w) + 2x f32 output tiles.
        return 2 * (a * c + c * b) * in_bytes + 2 * a * b * 4

    while footprint(tm, tn, tk) > budget:
        if tk > 128:
            tk = max(128, tk // 2)
        elif tn > 128:
            tn = max(128, tn // 2)
        elif tm > m_gran:
            tm = max(m_gran, tm // 2)
        else:
            break
    return tm, tn, tk


def _balanced_tile(dim, tile_default, gran):
    """Pick (tile, padded_dim, grid): tile is a multiple of `gran`,
    padded_dim = tile * grid >= dim, and total zero padding stays well below
    one full default tile (avoids doubling work for e.g. B=300 with tm=256)."""
    tile_default = max(gran, _round_up(tile_default, gran))
    dim_al = _round_up(dim, gran)
    grid = _cdiv(dim_al, tile_default)
    tile = _round_up(_cdiv(dim_al, grid), gran)
    return tile, tile * grid, grid


# ----------------------------------------------------------------------------
# Kernels
# ----------------------------------------------------------------------------
def _small_matmul_kernel(x_ref, w_ref, o_ref):
    """Single-block y = x @ W.T with W in native PyTorch (N, K) layout.

    Whole arrays live in VMEM (full-extent blocks); the RHS transpose of a
    tiny tile is negligible, and avoiding a wrapper-side transpose keeps the
    overhead-dominated fast path to a single HLO op.
    """
    o_ref[...] = lax.dot_general(
        x_ref[...],
        w_ref[...],
        dimension_numbers=(((1,), (1,)), ((), ())),
        preferred_element_type=jnp.float32,
    ).astype(o_ref.dtype)


def _matmul_acc_kernel(x_ref, w_ref, o_ref):
    """One (tm, tn) tile of y = x @ w, with w already in (K, N) layout.

    Accumulates over the K grid axis directly into the f32 output tile: the
    output BlockSpec ignores k, so the tile is VMEM-resident across the K
    axis — no separate accumulator scratch and no final copy.
    """
    @pl.when(pl.program_id(2) == 0)
    def _():
        o_ref[...] = jnp.zeros_like(o_ref)

    o_ref[...] += jnp.dot(
        x_ref[...], w_ref[...], preferred_element_type=jnp.float32
    )


# ----------------------------------------------------------------------------
# Wrapper
# ----------------------------------------------------------------------------
def mlp_forward(
    x,
    weight1,
    *,
    tm=512,
    tn=512,
    tk=1024,
    input_dtype=jnp.bfloat16,
    fast_path_bytes=1 << 20,
):
    """Pallas equivalent of MLP.forward: y = x @ weight1.T.

    x:       (..., num_h) float32
    weight1: (num_i, num_h) float32 (PyTorch linear1.weight as overridden)
    returns: (..., num_i) float32

    `input_dtype` (default bfloat16) is the MXU operand dtype on the tiled
    path; accumulation and output stay float32.  Pass None to keep x's dtype.
    The fast path (small problems) always uses the native dtypes.
    """
    orig_shape = x.shape
    K = orig_shape[-1]
    N, K2 = weight1.shape
    assert K == K2, "x last dim must equal num_h (weight1.shape[1])"

    x2 = x.reshape(-1, K)
    B = x2.shape[0]

    # ---- Fast path: whole problem fits comfortably in VMEM as one block. ---
    if (B * K + N * K + B * N) * 4 <= fast_path_bytes:
        out = pl.pallas_call(
            _small_matmul_kernel,
            out_shape=jax.ShapeDtypeStruct((B, N), jnp.float32),
        )(x2, weight1)
        return out.reshape(*orig_shape[:-1], N)

    # ---- Tiled path. --------------------------------------------------------
    in_dtype = x2.dtype if input_dtype is None else input_dtype
    in_bytes = np.dtype(in_dtype).itemsize
    # bf16 packs 2 rows per sublane -> (16, 128) min tile; f32 -> (8, 128).
    m_gran = {1: 32, 2: 16}.get(in_bytes, 8)

    budget = _vmem_budget_bytes()
    tm, tn, tk = _fit_tiles(
        _round_up(tm, m_gran), _round_up(tn, 128), _round_up(tk, 128),
        in_bytes, budget, m_gran,
    )

    tm, Mp, gm = _balanced_tile(B, tm, m_gran)
    tn, Np, gn = _balanced_tile(N, tn, 128)
    tk, Kp, gk = _balanced_tile(K, tk, 128)

    # v7x megacore: with a single M block, split N so a "parallel" grid axis
    # still has >= 2 blocks and both TensorCores get work.
    if gm == 1 and gn == 1 and Np >= 256:
        gn = 2
        tn = _round_up(_cdiv(_round_up(N, 128), gn), 128)
        Np = tn * gn

    # Zero padding keeps the matmul exact; padding is skipped entirely when
    # the shapes are already aligned (e.g. K % 128 == 0 and B % m_gran == 0).
    xp = x2.astype(in_dtype)
    if (Mp, Kp) != (B, K):
        xp = jnp.pad(xp, ((0, Mp - B), (0, Kp - K)))

    # One-time weight prep: transpose to (K, N) so the kernel needs no RHS
    # transpose on the MXU, cast to the operand dtype, pad to tile multiples.
    # This is a static parameter — hoist to model setup, or close the weight
    # over a jitted wrapper so XLA const-folds it (see __main__).
    wp = weight1.T.astype(in_dtype)
    if (Kp, Np) != (K, N):
        wp = jnp.pad(wp, ((0, Kp - K), (0, Np - N)))

    out_padded = pl.pallas_call(
        _matmul_acc_kernel,
        out_shape=jax.ShapeDtypeStruct((Mp, Np), jnp.float32),
        grid_spec=pltpu.PrefetchScalarGridSpec(
            num_scalar_prefetch=0,
            grid=(gm, gn, gk),
            in_specs=[
                # x tile: (tm, tk) at block (i, k)
                pl.BlockSpec((tm, tk), lambda i, j, k: (i, k)),
                # weight tile in pre-transposed (K, N) layout: (tk, tn) at (k, j)
                # TODO(synk): if v5e profiling shows exposed DMA on this stream,
                # add pipeline_mode=pl.Buffered(3) here.
                pl.BlockSpec((tk, tn), lambda i, j, k: (k, j)),
            ],
            out_specs=pl.BlockSpec((tm, tn), lambda i, j, k: (i, j)),
        ),
        compiler_params=pltpu.CompilerParams(
            # M/N independent -> parallel (megacore sharding); K accumulates.
            dimension_semantics=("parallel", "parallel", "arbitrary"),
            vmem_limit_bytes=budget,
        ),
    )(xp, wp)

    out = out_padded[:B, :N]
    return out.reshape(*orig_shape[:-1], N)


if __name__ == "__main__":
    key = jax.random.PRNGKey(0)
    k_w1, k_w2, k_w3, k_x, k_xb, k_wb = jax.random.split(key, 6)

    # ---- 1) Module-sized check: hits the single-tile fast path (exact f32). --
    num_i, num_h, num_o = 32, 64, 16
    batch = 8

    # Deterministic parameter init mirroring torch.randn(...) * 1e-5.
    weight1 = jax.random.normal(k_w1, (num_i, num_h), jnp.float32) * 1e-5
    weight2 = jax.random.normal(k_w2, (num_h, num_h), jnp.float32) * 1e-5  # dead code in forward
    weight3 = jax.random.normal(k_w3, (num_h, num_o), jnp.float32) * 1e-5  # dead code in forward

    # Input last dim must be num_h given the overridden weight shape.
    x = jax.random.normal(k_x, (batch, num_h), jnp.float32)

    out = jax.block_until_ready(mlp_forward(x, weight1))
    ref = x @ weight1.T
    assert out.shape == (batch, num_i)
    assert jnp.allclose(out, ref, atol=1e-6, rtol=1e-5), "fast-path mismatch"

    # ---- 2) Tiled-path check: bf16 operands, f32 accumulation, ragged dims ---
    # (exercises padding, the multi-block grid, and K-axis accumulation).
    Bb, Kb, Nb = 200, 640, 384
    wb = jax.random.normal(k_wb, (Nb, Kb), jnp.float32) * 1e-5
    xb = jax.random.normal(k_xb, (Bb, Kb), jnp.float32)

    # Close the weight over a jitted wrapper so its one-time transpose / bf16
    # cast / padding const-fold at compile time instead of running per call.
    fwd = jax.jit(lambda a: mlp_forward(a, wb, tm=128, tn=256, tk=256))
    outb = jax.block_until_ready(fwd(xb))
    refb = xb @ wb.T
    assert outb.shape == (Bb, Nb)
    # bf16 operands -> relative tolerance (f32 accumulation keeps it tight).
    assert jnp.allclose(outb, refb, rtol=5e-2, atol=1e-5), "tiled-path mismatch"

    print("KERNEL_OK")
</pallas_src>

<mosaic_0001>
module attributes {stable_mosaic.version = 11 : i64} {
  func.func @_small_matmul_kernel(%arg0: memref<8x64xf32, #tpu.memory_space<vmem>>, %arg1: memref<32x64xf32, #tpu.memory_space<vmem>>, %arg2: memref<8x32xf32, #tpu.memory_space<vmem>>) attributes {dimension_semantics = [], scalar_prefetch = 0 : i64, scratch_operands = 0 : i64, tpu.core_type = #tpu.core_type<tc>} {
    %c0 = arith.constant 0 : index
    %c0_0 = arith.constant 0 : index
    %0 = vector.load %arg0[%c0, %c0_0] : memref<8x64xf32, #tpu.memory_space<vmem>>, vector<8x64xf32>
    %c0_1 = arith.constant 0 : index
    %c0_2 = arith.constant 0 : index
    %1 = vector.load %arg1[%c0_1, %c0_2] : memref<32x64xf32, #tpu.memory_space<vmem>>, vector<32x64xf32>
    %cst = arith.constant dense<0.000000e+00> : vector<8x32xf32>
    %2 = tpu.matmul %0, %1, %cst {dimension_numbers = #tpu.dot_dimension_numbers<[1], [1], [0], [0], [0, 0, 1, 0], [], []>} : vector<8x64xf32>, vector<32x64xf32>, vector<8x32xf32> -> vector<8x32xf32>
    %c0_3 = arith.constant 0 : index
    %c0_4 = arith.constant 0 : index
    %3 = vector.load %arg2[%c0_3, %c0_4] : memref<8x32xf32, #tpu.memory_space<vmem>>, vector<8x32xf32>
    tpu.vector_store %arg2[%c0_3, %c0_4], %2 {strides = array<i32>} : memref<8x32xf32, #tpu.memory_space<vmem>>, vector<8x32xf32>,
    return
  }
}

</mosaic_0001>

<bundles_post_ra>
// kernel: tpu_custom_call.1
= control target key start
LH: loop header
LB: loop body
LE: loop exit
PB: predicated region body
PF: predicated region fallthrough
CT: control target
= control target key end

     0   :  { %7 = vsyncpa [#allocation3], 0  ;;  %s220_s0 = inlined_call_operand.hbm [shape: f32[8,64], index: 0, kind: input, shape index: {}]   ;;  %s221_s1 = inlined_call_operand.hbm [shape: f32[32,64], index: 1, kind: input, shape index: {}]   ;;  %s222_s2 = inlined_call_operand.hbm [shape: f32[8,32], index: 2, kind: output, shape index: {}]  }
   0x1   :  { %8 = vsyncpa [#allocation6], 0 }
   0x2   :  { %9 = vsyncpa [#allocation4], 0  ;;  %s15_s11 = sshll.u32 %s220_s0, 4  ;;  %s191_s12 = smov [#allocation2]   ;;  %s16_s11 = int_to_ptr.hbm [resolvable:$true] %s15_s11 }
   0x3   :  { %s17_s13 = sshll.u32 %s191_s12, 4  ;;  %s25_s16 = sshll.u32 %s221_s1, 4  ;;  %s18_s13 = int_to_ptr.vmem [resolvable:$true] %s17_s13  ;;  %s26_s16 = int_to_ptr.hbm [resolvable:$true] %s25_s16 }
   0x4   :  { %20 = dma.hbm_to_vmem [thread:$0]  %s16_s11, 128, %s18_s13, [#allocation3]  }
   0x5   :  { %s192_s17 = smov [#allocation5]   ;;  %s193_s19 = smov 128  }
   0x6   :  { %s27_s18 = sshll.u32 %s192_s17, 4  ;;  %s194_s20 = smov 8   ;;  %s28_s18 = int_to_ptr.vmem [resolvable:$true] %s27_s18 }
   0x7   :  { %33 = dma.hbm_to_vmem [thread:$0]  %s26_s16, 512, %s28_s18, [#allocation6], %s193_s19, %s193_s19, %s194_s20  }
   0x8   :  { %185 = dma.done.wait [#allocation3], 128  }
   0x9   :  { %186 = vsyncadd [#allocation3], 4294967168 }
   0xa   :  { %187 = dma.done.wait [#allocation6], 512  }
   0xb   :  { %188 = vsyncadd [#allocation6], 4294966784  ;;  %vm47_vm0 = vcmask 523264   ;;  %v46_v0 = vld [vmem:[#allocation5 + $0x18] sm:$0xff]  ;;  %v45_v1 = vld [vmem:[#allocation5 + $0x10] sm:$0xff]  ;;  %s195_s0 = smov [#allocation7]  }
   0xc   :  { %103 = vmatpush.xpose.msk.msra.mxu0 %vm47_vm0, %v46_v0  ;;  %v44_v2 = vld [vmem:[#allocation5 + $0x8] sm:$0xff]  ;;  %v43_v3 = vld [vmem:[#allocation5] sm:$0xff]  ;;  %v42_v4 = vld [vmem:[#allocation2] sm:$0xff]  ;;  %s90_s1 = sshll.u32 %s195_s0, 4  ;;  %s92_s23 = sshll.u32 %s222_s2, 4  ;;  %vm83_vm1 = vcmask 261120   ;;  %s91_s1 = int_to_ptr.vmem [resolvable:$true] %s90_s1  ;;  %s93_s23 = int_to_ptr.hbm [resolvable:$true] %s92_s23 }
  0x10   :  { %104 = vmatpush.xpose.msk.msra.mxu0 %vm47_vm0, %v45_v1 }
  0x14   :  { %105 = vmatpush.xpose.msk.msra.mxu0 %vm47_vm0, %v44_v2 }
  0x18   :  { %106 = vmatpush.xpose.msk.msra.mxu0 %vm47_vm0, %v43_v3 }
  0x1b   :  { %107 = vmatmul.msk.f32.vlgmr.msra.gmra.mxu0 %vm47_vm0, %v42_v4 }
  0x98   :  { %v80_v5 = vpop.f32.mrf.mxu0 }
  0x99   :  { %84 = vst.msk [vmem:[#allocation7] sm:$0xff] %vm83_vm1, %v80_v5 }
  0x9a   :  { %95 = dma.vmem_to_hbm [thread:$0]  %s91_s1, 128, %s93_s23, [#allocation4]  }
  0x9b   :  { %189 = dma.done.wait [#allocation4], 128  }
  0x9c   :  { %190 = vsyncadd [#allocation4], 4294967168 }
  0x9d   :  { %100 = vsyncpa [#allocation3], 1 }
  0x9e   :  { %101 = vsyncpa [#allocation6], 1 }
  0x9f   :  { %102 = vsyncpa [#allocation4], 1 }

</bundles_post_ra>
